<compile_context>
chip_gen: v7x
topology: tpu7x:2x2x1
jax: 0.10.0
libtpu: 0.0.40
codegen_flags: <defaults>
</compile_context>

<pallas_src>
import functools

import jax
import jax.numpy as jnp
from jax.experimental import pallas as pl
from jax.experimental.pallas import tpu as pltpu

NEG_INF = float("-inf")


def _round_up(x, m):
    return ((x + m - 1) // m) * m


def _vmem_capacity_bytes():
    """Physical VMEM of the current TPU generation (conservative fallback)."""
    try:
        info = pltpu.get_tpu_info()
        cap = getattr(info, "vmem_capacity_bytes", None)
        if cap:
            return int(cap)
    except Exception:
        pass
    return 64 << 20  # v7x per-TensorCore size: safe lower bound for all gens


def _td_linear_kernel(h_out, tile_valid_ref, x_ref, w_ref, b_ref, o_ref):
    """One row tile: masked Linear on valid rows, -inf passthrough on padding."""
    i = pl.program_id(0)

    @pl.when(tile_valid_ref[i] == 0)
    def _():
        # Entire tile is packing padding -> write -inf, skip the MXU/VPU work.
        o_ref[...] = jnp.full(o_ref.shape, NEG_INF, dtype=o_ref.dtype)

    @pl.when(tile_valid_ref[i] != 0)
    def _():
        x = x_ref[...]                                           # (TM, F) f32
        # mask = (flat != -inf).any(dim=1)  -- exact module semantics per row
        mask = jnp.any(x != NEG_INF, axis=1, keepdims=True)      # (TM, 1)
        # zero-out padded rows so -inf never hits the MXU (mask/where in f32:
        # keeps the elementwise path v5e-safe, no bf16 VPU there)
        x_safe = jnp.where(mask, x, 0.0)
        # matmul in the weight's dtype (bf16), f32 accumulate, lane-dense N
        y = jnp.dot(x_safe.astype(w_ref.dtype), w_ref[...],
                    preferred_element_type=jnp.float32) + b_ref[...]  # (TM, Hp)
        # store only the real H columns (masked tail-lane vst; no extra HBM pass)
        o_ref[...] = jnp.where(mask, y[:, :h_out], NEG_INF).astype(o_ref.dtype)


def time_distributed_linear(padded, lengths, weight, bias, *,
                            tm=512, matmul_dtype=jnp.bfloat16):
    """
    padded : (B, T, F) float32, padding positions filled with -inf
    lengths: (B,) int32 (carried through unchanged, like PackedSequence lengths)
    weight : (F, H) float32   (== torch Linear.weight.T)
    bias   : (H,)  float32
    returns (out_padded (B, T, H), lengths)
    """
    B, T, F = padded.shape
    H = weight.shape[1]
    rows = B * T
    flat = padded.reshape(rows, F)          # metadata-only, no extra HBM pass

    # Pad the weight/bias columns to a 128-lane multiple so the MXU sees a
    # lane-dense N; the kernel slices back to H before storing.
    H_pad = _round_up(H, 128)
    if H_pad != H:
        weight = jnp.pad(weight, ((0, 0), (0, H_pad - H)))
        bias = jnp.pad(bias, (0, H_pad - H))
    w_mxu = weight.astype(matmul_dtype)     # cast once in the wrapper
    bias2d = bias.reshape(1, H_pad).astype(jnp.float32)

    # ---- generation-aware VMEM sizing --------------------------------------
    vmem_cap = _vmem_capacity_bytes()
    budget = int(vmem_cap * 0.75)           # ~48 MiB v7x, ~96 MiB v5e/v6e
    limit_cap = int(vmem_cap * 0.875)       # ~56 MiB v7x, ~112 MiB v5e/v6e

    # one copy of weight + bias; Pallas allocates 2 pipeline buffers even for
    # constant-index inputs, so the need below counts it twice.
    w_bytes = F * H_pad * jnp.dtype(matmul_dtype).itemsize + H_pad * 4

    def _vmem_need(tm_):
        return (2 * tm_ * F * 4             # double-buffered input row tiles (f32)
                + 2 * tm_ * H_pad * 4       # double-buffered output row tiles (f32)
                + 2 * w_bytes)              # weight + bias (double-buffered)

    # Tile sizing: clamp to the (8-aligned) row count, keep >= 2 grid blocks so
    # both TensorCores get work on v7x, then shrink until we fit the budget.
    tm = min(tm, _round_up(rows, 8))
    if rows > 8:
        tm = min(tm, _round_up((rows + 1) // 2, 8))
    while tm > 8 and _vmem_need(tm) > budget:
        tm //= 2
    tm = max(8, (tm // 8) * 8)
    # TODO(synk): if F*H_pad ever approaches ~1/3 of the budget, add a K grid
    #             axis over F ("arbitrary") with a VMEM f32 accumulator instead
    #             of shrinking tm below ~256 rows.

    vmem_limit = int(min(max(_vmem_need(tm) + (4 << 20), 32 << 20), limit_cap))

    # ---- per-tile "has any valid row" flags from lengths (scalar prefetch) --
    n_tiles = pl.cdiv(rows, tm)
    t_idx = jnp.arange(T, dtype=jnp.int32)
    row_valid = (t_idx[None, :] < lengths.astype(jnp.int32)[:, None]).reshape(-1)
    pad_amount = n_tiles * tm - rows
    if pad_amount:
        row_valid = jnp.concatenate(
            [row_valid, jnp.zeros((pad_amount,), dtype=row_valid.dtype)])
    tile_valid = jnp.any(row_valid.reshape(n_tiles, tm), axis=1).astype(jnp.int32)

    out_flat = pl.pallas_call(
        functools.partial(_td_linear_kernel, H),
        out_shape=jax.ShapeDtypeStruct((rows, H), padded.dtype),
        grid_spec=pltpu.PrefetchScalarGridSpec(
            num_scalar_prefetch=1,
            grid=(n_tiles,),
            in_specs=[
                pl.BlockSpec((tm, F), lambda i, flags: (i, 0)),     # input rows
                pl.BlockSpec((F, H_pad), lambda i, flags: (0, 0)),  # weight
                pl.BlockSpec((1, H_pad), lambda i, flags: (0, 0)),  # bias
            ],
            out_specs=pl.BlockSpec((tm, H), lambda i, flags: (i, 0)),
        ),
        compiler_params=pltpu.CompilerParams(
            dimension_semantics=("parallel",),
            vmem_limit_bytes=vmem_limit),
    )(tile_valid, flat, w_mxu, bias2d)

    out_padded = out_flat.reshape(B, T, H)
    return out_padded, lengths


def _reference(padded, lengths, weight, bias, matmul_dtype=jnp.bfloat16):
    """Plain-JAX reference of the same semantics (same matmul dtype)."""
    B, T, F = padded.shape
    H = weight.shape[1]
    flat = padded.reshape(B * T, F)
    mask = jnp.any(flat != NEG_INF, axis=1, keepdims=True)
    x_safe = jnp.where(mask, flat, 0.0)
    y = jnp.dot(x_safe.astype(matmul_dtype), weight.astype(matmul_dtype),
                preferred_element_type=jnp.float32) + bias
    out = jnp.where(mask, y, NEG_INF)
    return out.reshape(B, T, H), lengths


if __name__ == "__main__":
    # Small shapes consistent with the module's forward:
    batch, pad_length, features, hidden = 2, 8, 16, 32
    key = jax.random.PRNGKey(0)
    k_x, k_w, k_b = jax.random.split(key, 3)

    # Build a "padded packed sequence": valid data for t < lengths[b], -inf pad.
    lengths = jnp.array([8, 5], dtype=jnp.int32)
    data = jax.random.normal(k_x, (batch, pad_length, features), dtype=jnp.float32)
    t_idx = jnp.arange(pad_length)[None, :, None]                       # (1, T, 1)
    valid = t_idx < lengths[:, None, None]                              # (B, T, 1)
    padded = jnp.where(valid, data, NEG_INF)

    # Deterministic Linear(features, hidden) params (torch-style uniform init).
    bound = 1.0 / (features ** 0.5)
    weight = jax.random.uniform(k_w, (features, hidden), jnp.float32, -bound, bound)
    bias = jax.random.uniform(k_b, (hidden,), jnp.float32, -bound, bound)

    out, out_lengths = time_distributed_linear(padded, lengths, weight, bias)
    out = jax.block_until_ready(out)

    ref, _ = _reference(padded, lengths, weight, bias)
    # valid rows match the Linear (bf16 MXU, f32 accumulate); padding rows are -inf
    finite = jnp.isfinite(ref)
    ok = jnp.where(finite, jnp.abs(out - ref) < 1e-3, out == ref)
    assert bool(jnp.all(ok))
    assert bool(jnp.all(out_lengths == lengths))
    print("KERNEL_OK")
</pallas_src>

<mosaic_0001>
module attributes {stable_mosaic.version = 11 : i64} {
  func.func @_td_linear_kernel(%arg0: i32, %arg1: memref<2xi32, #tpu.memory_space<smem>>, %arg2: memref<8x16xf32, #tpu.memory_space<vmem>>, %arg3: memref<16x128xbf16, #tpu.memory_space<vmem>>, %arg4: memref<1x128xf32, #tpu.memory_space<vmem>>, %arg5: memref<8x32xf32, #tpu.memory_space<vmem>>) attributes {dimension_semantics = [#tpu.dimension_semantics<parallel>], iteration_bounds = array<i64: 2>, scalar_prefetch = 1 : i64, scratch_operands = 0 : i64, tpu.core_type = #tpu.core_type<tc>, window_params = [{transform_indices = @transform_0, window_bounds = array<i64: 8, 16>}, {pipeline_mode = #tpu.pipeline_mode<synchronous>, transform_indices = @transform_1, window_bounds = array<i64: 16, 128>}, {pipeline_mode = #tpu.pipeline_mode<synchronous>, transform_indices = @transform_2, window_bounds = array<i64: 1, 128>}, {transform_indices = @transform_3, window_bounds = array<i64: 8, 32>}]} {
    %0 = arith.index_cast %arg0 : i32 to index
    %1 = memref.load %arg1[%0] : memref<2xi32, #tpu.memory_space<smem>>
    %c0_i32 = arith.constant 0 : i32
    %2 = arith.cmpi eq, %1, %c0_i32 : i32
    %3 = arith.extui %2 : i1 to i32
    %c0_i32_0 = arith.constant 0 : i32
    %4 = arith.cmpi ne, %3, %c0_i32_0 : i32
    scf.if %4 {
      %cst = arith.constant 0xFF800000 : f32
      %10 = vector.broadcast %cst : f32 to vector<8x32xf32>
      %c0 = arith.constant 0 : index
      %c0_3 = arith.constant 0 : index
      %11 = vector.load %arg5[%c0, %c0_3] : memref<8x32xf32, #tpu.memory_space<vmem>>, vector<8x32xf32>
      tpu.vector_store %arg5[%c0, %c0_3], %10 {strides = array<i32>} : memref<8x32xf32, #tpu.memory_space<vmem>>, vector<8x32xf32>,
    } else {
    }
    %5 = arith.index_cast %arg0 : i32 to index
    %6 = memref.load %arg1[%5] : memref<2xi32, #tpu.memory_space<smem>>
    %c0_i32_1 = arith.constant 0 : i32
    %7 = arith.cmpi ne, %6, %c0_i32_1 : i32
    %8 = arith.extui %7 : i1 to i32
    %c0_i32_2 = arith.constant 0 : i32
    %9 = arith.cmpi ne, %8, %c0_i32_2 : i32
    scf.if %9 {
      %c0 = arith.constant 0 : index
      %c0_3 = arith.constant 0 : index
      %10 = vector.load %arg2[%c0, %c0_3] : memref<8x16xf32, #tpu.memory_space<vmem>>, vector<8x16xf32>
      %cst = arith.constant 0xFF800000 : f32
      %11 = vector.broadcast %cst : f32 to vector<8x16xf32>
      %12 = arith.cmpf one, %10, %11 : vector<8x16xf32>
      %cst_4 = arith.constant 1.000000e+00 : f32
      %cst_5 = arith.constant 0.000000e+00 : f32
      %13 = vector.broadcast %cst_4 : f32 to vector<8x16xf32>
      %14 = vector.broadcast %cst_5 : f32 to vector<8x16xf32>
      %15 = arith.select %12, %13, %14 : vector<8x16xi1>, vector<8x16xf32>
      %cst_6 = arith.constant dense<0xFF800000> : vector<8xf32>
      %16 = vector.multi_reduction <maximumf>, %15, %cst_6 [1] : vector<8x16xf32> to vector<8xf32>
      %cst_7 = arith.constant 0.000000e+00 : f32
      %17 = vector.broadcast %cst_7 : f32 to vector<8xf32>
      %18 = arith.cmpf ogt, %16, %17 : vector<8xf32>
      %19 = vector.shape_cast %18 : vector<8xi1> to vector<8x1xi1>
      %cst_8 = arith.constant 0.000000e+00 : f32
      %20 = vector.shape_cast %19 : vector<8x1xi1> to vector<8x1xi1>
      %21 = vector.broadcast %20 : vector<8x1xi1> to vector<8x16xi1>
      %22 = vector.broadcast %cst_8 : f32 to vector<8x16xf32>
      %23 = arith.select %21, %10, %22 : vector<8x16xi1>, vector<8x16xf32>
      %24 = arith.truncf %23 : vector<8x16xf32> to vector<8x16xbf16>
      %c0_9 = arith.constant 0 : index
      %c0_10 = arith.constant 0 : index
      %25 = vector.load %arg3[%c0_9, %c0_10] : memref<16x128xbf16, #tpu.memory_space<vmem>>, vector<16x128xbf16>
      %cst_11 = arith.constant dense<0.000000e+00> : vector<8x128xf32>
      %26 = tpu.matmul %24, %25, %cst_11 {dimension_numbers = #tpu.dot_dimension_numbers<[1], [0], [0], [1], [0, 0, 1, 1], [], []>} : vector<8x16xbf16>, vector<16x128xbf16>, vector<8x128xf32> -> vector<8x128xf32>
      %c0_12 = arith.constant 0 : index
      %c0_13 = arith.constant 0 : index
      %27 = vector.load %arg4[%c0_12, %c0_13] : memref<1x128xf32, #tpu.memory_space<vmem>>, vector<1x128xf32>
      %28 = vector.broadcast %27 : vector<1x128xf32> to vector<8x128xf32>
      %29 = arith.addf %26, %28 : vector<8x128xf32>
      %30 = vector.extract_strided_slice %29 {offsets = [0, 0], sizes = [8, 32], strides = [1, 1]} : vector<8x128xf32> to vector<8x32xf32>
      %cst_14 = arith.constant 0xFF800000 : f32
      %31 = vector.shape_cast %19 : vector<8x1xi1> to vector<8x1xi1>
      %32 = vector.broadcast %31 : vector<8x1xi1> to vector<8x32xi1>
      %33 = vector.broadcast %cst_14 : f32 to vector<8x32xf32>
      %34 = arith.select %32, %30, %33 : vector<8x32xi1>, vector<8x32xf32>
      %c0_15 = arith.constant 0 : index
      %c0_16 = arith.constant 0 : index
      %35 = vector.load %arg5[%c0_15, %c0_16] : memref<8x32xf32, #tpu.memory_space<vmem>>, vector<8x32xf32>
      tpu.vector_store %arg5[%c0_15, %c0_16], %34 {strides = array<i32>} : memref<8x32xf32, #tpu.memory_space<vmem>>, vector<8x32xf32>,
    } else {
    }
    return
  }
  func.func @transform_0(%arg0: i32, %arg1: memref<2xi32, #tpu.memory_space<smem>>) -> (i32, i32) {
    %c0_i32 = arith.constant 0 : i32
    %c0_i32_0 = arith.constant 0 : i32
    return %arg0, %c0_i32 : i32, i32
  }
  func.func @transform_1(%arg0: i32, %arg1: memref<2xi32, #tpu.memory_space<smem>>) -> (i32, i32) {
    %c0_i32 = arith.constant 0 : i32
    %c0_i32_0 = arith.constant 0 : i32
    %c0_i32_1 = arith.constant 0 : i32
    return %c0_i32, %c0_i32_0 : i32, i32
  }
  func.func @transform_2(%arg0: i32, %arg1: memref<2xi32, #tpu.memory_space<smem>>) -> (i32, i32) {
    %c0_i32 = arith.constant 0 : i32
    %c0_i32_0 = arith.constant 0 : i32
    %c0_i32_1 = arith.constant 0 : i32
    return %c0_i32, %c0_i32_0 : i32, i32
  }
  func.func @transform_3(%arg0: i32, %arg1: memref<2xi32, #tpu.memory_space<smem>>) -> (i32, i32) {
    %c0_i32 = arith.constant 0 : i32
    %c0_i32_0 = arith.constant 0 : i32
    return %arg0, %c0_i32 : i32, i32
  }
}

</mosaic_0001>

<bundles_post_ra>
// kernel: tpu_custom_call.1
= control target key start
LH: loop header
LB: loop body
LE: loop exit
PB: predicated region body
PF: predicated region fallthrough
CT: control target
= control target key end

     0   :  { %s865_s0 = inlined_call_operand.hbm [shape: s32[2], index: 0, kind: input, shape index: {}]   ;;  %s866_s1 = inlined_call_operand.hbm [shape: f32[16,16], index: 1, kind: input, shape index: {}]   ;;  %s867_s2 = inlined_call_operand.hbm [shape: bf16[16,128], index: 2, kind: input, shape index: {}]   ;;  %s868_s3 = inlined_call_operand.vmem [shape: f32[1,128], index: 3, kind: input, shape index: {}]   ;;  %s869_s4 = inlined_call_operand.hbm [shape: f32[16,32], index: 4, kind: output, shape index: {}]  }
   0x1   :  { %s477_s17 = scalar_lea.hbm %s865_s0, 16 }
   0x2   :  { %p478_p0 = scmp.ne.s32.totalorder %s865_s0, %s477_s17  ;;  %p481_p1 = scmp.lt.u32.totalorder %s477_s17, %s865_s0 }
   0x4   :  { %p483_p2 = pnand %p481_p1, %p478_p0 }
   0x6   :  { %486 = shalt.err (!%p483_p2)  }
   0x7   :  { %s619_s22 = smov [#allocation3]  }
   0x8   :  { %10 = dma.hbm_to_smem %s865_s0, 16, %s619_s22, [#allocation2] }
   0x9   :  { %589 = dma.done.wait [#allocation2], 16 }
   0xa   :  { %590 = vsyncadd [#allocation2], 4294967280 }
   0xb   :  { %12 = sfence }
   0xc   :  { %13 = vsyncpa [#allocation5], 0 }
   0xd   :  { %15 = vsyncpa [#allocation5 + $0x1], 0 }
   0xe   :  { %16 = vsyncpa [#allocation8], 0 }
   0xf   :  { %17 = vsyncpa [#allocation6], 0 }
  0x10   :  { %19 = vsyncpa [#allocation6 + $0x1], 0  ;;  %s665_s25 = smov 0   ;;  %s667_s26 = smov 0  }
  0x11   :  { %s669_s27 = smov 0   ;;  %s671_s28 = smov 0  }
  0x12 LB: > { %s686_s0 = sadd.s32 4294967295, %s617_s28   ;;  %s386_s29 = sadd.s32 4294967294, %s617_s28   ;;  %s617_s28 = sphi %s671_s28, %s889_s28   ;;  %s613_s27 = sphi %s669_s27, %s888_s27   ;;  %s609_s26 = sphi %s667_s26, %s887_s26   ;;  %s605_s25 = sphi %s665_s25, %s886_s25  }
  0x13   : > { %p45_p3 = scmp.ne.s32.totalorder %s609_s26, %s605_s25  ;;  %p870_p4 = scmp.eq.s32.totalorder %s686_s0, 0 }
  0x14   : > { %p117_p6 = scmp.eq.s32.totalorder %s386_s29, 1  ;;  %p387_p8 = scmp.ge.s32.totalorder %s617_s28, 1 }
  0x15   : > { %p695_p7 = por %p870_p4, %p45_p3  ;;  %p124_p10 = scmp.lt.s32.totalorder %s617_s28, 3 }
  0x16   : > { %p700_p9 = por %p117_p6, %p45_p3  ;;  %s620_s7 = smov [#allocation7]  }
  0x17   : > { %s873_s30 = scalar_select %p695_p7, 1, 0 }
  0x18   : > { %s874_s5 = scalar_select %p700_p9, 1, 0 }
  0x19   : > { %p705_p11 = pnand %p387_p8, %p124_p10  ;;  %s136_s8 = sshll.u32 %s620_s7, 4  ;;  %s709_s8 = int_to_ptr.vmem [resolvable:$true] %s136_s8 }
  0x1a   : > { %s721_s10 = sadd.s32 1, %s617_s28   ;;  %s32_s11 = sadd.s32 1, %s613_s27 }
  0x1b   : > { %s875_s6 = scalar_select %p705_p11, 1, 0 }
  0x1c   : > { %p421_p12 = pneg %p705_p11  ;;  %s29_s12 = ssub.s32 %s617_s28, %s721_s10 }
  0x1d   : > { %s487_s15 = scalar_lea.hbm %s867_s2, 128 }
  0x1e   : > { %p716_p0 = pnand %p421_p12, %p870_p4  ;;  %p488_p1 = scmp.ne.s32.totalorder %s867_s2, %s487_s15 }
  0x1f   : > { %p494_p8 = scmp.lt.u32.totalorder %s487_s15, %s867_s2 }
  0x20   : > { %p489_p2 = pneg %p716_p0 }
  0x22   : > { %p490_p3 = pnand %p489_p2, %p488_p1 }
  0x24   : > { %p491_p6 = pneg %p490_p3 }
  0x26   : > { %p496_p10 = pnand %p494_p8, %p491_p6 }
  0x28   : > { %499 = shalt.err (!%p496_p10)
}
  0x29   : > { %s500_s20 = scalar_lea.vmem %s709_s8, 128  ;;  %p508_p5 = scmp.lt.s32.totalorder %s709_s8, %s709_s8 }
  0x2a   : > { %p501_p12 = scmp.ne.s32.totalorder %s709_s8, %s500_s20  ;;  %p509_p9 = scmp.lt.s32.totalorder %s500_s20, %s500_s20 }
  0x2c   : > { %p503_p13 = pnand %p501_p12, %p489_p2  ;;  %p510_p7 = por %p509_p9, %p508_p5 }
  0x2e   : > { %p504_p4 = pneg %p503_p13 }
  0x30   : > { %p511_p11 = pnand %p510_p7, %p504_p4 }
  0x32   : > { %514 = shalt.err (!%p511_p11)
}
  0x33   : > { %s621_s21 = smov 64   ;;  %s622_s22 = smov 4  }
  0x34   : > { %424 = dma.hbm_to_vmem [thread:$0]  (!%p716_p0), %s867_s2, 128, %s709_s8, [#allocation8], %s621_s21, %s621_s21, %s622_s22  }
  0x35   : > { %p30_p5 = scmp.eq.s32.totalorder %s29_s12, 0  ;;  %p39_p4 = scmp.ne.s32.totalorder %s613_s27, %s609_s26 }
  0x36   : > { %p40_p7 = scmp.eq.s32.totalorder %s617_s28, 0  ;;  %p434_p9 = scmp.lt.s32.totalorder %s617_s28, 2 }
  0x37   : > { %s752_s29 = scalar_select %p30_p5, %s613_s27, %s32_s11  }
  0x38   : > { %p41_p11 = por %p40_p7, %p39_p4  ;;  %p877_p13 = scmp.eq.s32.totalorder %s686_s0, 1 }
  0x39   : > { %s153_s13 = sand.u32 1, %s613_s27   ;;  %s391_s14 = sshll.u32 %s617_s28, 7 }
  0x3a   : > { %p756_p1 = por %p877_p13, %p39_p4  ;;  %s390_s15 = sshll.u32 %s153_s13, 3 }
  0x3b   : > { %s765_s17 = scalar_lea.hbm %s866_s1, %s391_s14  ;;  %s157_s8 = scalar_lea.vmem [#allocation4], %s390_s15 }
  0x3c   : > { %s164_s11 = sshll.u32 %s157_s8, 4  ;;  %p767_p0 = pnand %p434_p9, %p41_p11  ;;  %s771_s11 = int_to_ptr.vmem [resolvable:$true] %s164_s11 }
  0x3d   : > { %s154_s18 = scalar_lea.sflag [#allocation5], %s153_s13  ;;  %s515_s19 = scalar_lea.hbm %s765_s17, 128 }
  0x3e   : > { %p516_p2 = scmp.ne.s32.totalorder %s765_s17, %s515_s19  ;;  %p517_p3 = pneg %p767_p0 }
  0x3f   : > { %s520_s22 = scalar_lea.hbm %s866_s1, 256  ;;  %p521_p10 = scmp.lt.u32.totalorder %s765_s17, %s866_s1 }
  0x40   : > { %p518_p6 = pnand %p517_p3, %p516_p2  ;;  %p522_p12 = scmp.lt.u32.totalorder %s520_s22, %s515_s19 }
  0x41   : > { %p524_p4 = scmp.lt.u32.totalorder %s515_s19, %s765_s17 }
  0x42   : > { %p519_p8 = pneg %p518_p6  ;;  %p523_p5 = por %p522_p12, %p521_p10 }
  0x44   : > { %p525_p7 = por %p524_p4, %p523_p5 }
  0x46   : > { %p526_p9 = pnand %p525_p7, %p519_p8 }
  0x48   : > { %529 = shalt.err (!%p526_p9)
}
  0x49   : > { %s530_s13 = scalar_lea.vmem %s771_s11, 128  ;;  %s623_s14 = smov [#allocation4]  }
  0x4a   : > { %p531_p11 = scmp.ne.s32.totalorder %s771_s11, %s530_s13  ;;  %s535_s15 = sshll.u32 %s623_s14, 4  ;;  %s536_s15 = int_to_ptr.vmem [resolvable:$false] %s535_s15 }
  0x4b   : > { %s537_s9 = scalar_lea.vmem %s536_s15, 256  ;;  %p538_p6 = scmp.lt.s32.totalorder %s771_s11, %s536_s15 }
  0x4c   : > { %p533_p13 = pnand %p531_p11, %p517_p3  ;;  %p539_p10 = scmp.lt.s32.totalorder %s537_s9, %s530_s13 }
  0x4e   : > { %p534_p2 = pneg %p533_p13  ;;  %p540_p12 = por %p539_p10, %p538_p6 }
  0x50   : > { %p541_p5 = pnand %p540_p12, %p534_p2 }
  0x52   : > { %544 = shalt.err (!%p541_p5)
}
  0x53   : > { %428 = dma.hbm_to_vmem [thread:$0]  (!%p767_p0), %s765_s17, 128, %s771_s11, %s154_s18  }
  0x54   : > { %p880_p8 = scmp.ne.s32.totalorder %s875_s6, 0 }
  0x55   : > { %s801_s16 = sand.u32 (!%p880_p8), 1, %s609_s26   ;;  %p881_p3 = scmp.ne.s32.totalorder (!%p880_p8), %s873_s30, 0 }
  0x56   : > { %173 = sbr.rel (%p880_p8) target bundleno = 509 (0x1fd), region = 32  ;;  %s393_s8 = sshll.u32 (!%p880_p8), %s801_s16, 3 }
  0x57   : > { %s176_s19 = scalar_lea.sflag (!%p880_p8), [#allocation5], %s801_s16  ;;  %s179_s20 = scalar_lea.vmem (!%p880_p8), [#allocation4], %s393_s8 }
  0x5d   : > { %592 = dma.done.wait (%p881_p3), %s176_s19, 128  }
  0x5e   : > { %594 = vsyncadd (%p881_p3), %s176_s19, 4294967168  ;;  %p882_p4 = scmp.eq.s32.totalorder %s686_s0, 0 }
  0x60   : > { %596 = dma.done.wait (%p882_p4), [#allocation8], 128   ;;  %p883_p0 = pmov %p882_p4 }
  0x61   : > { %s207_s6 = sld [smem:[#allocation3 + %s686_s0]]  ;;  %s814_s17 = scalar_lea.vmem [#allocation9], %s393_s8 }
  0x62   : > { %598 = vsyncadd (%p883_p0), [#allocation8], 4294967168 }
  0x67   : > { %p396_p7 = scmp.ne.s32.totalorder %s207_s6, 0 }
  0x68   : > { %vm212_vm0 = vcmask (!%p396_p7), 261120   ;;  %v624_v0 = vmov (!%p396_p7), -inf  }
  0x69   : > { %211 = sbr.rel (%p396_p7) target bundleno = 112 (0x70), region = 44  ;;  %213 = vst.msk [vmem:[%s814_s17] sm:$0xff] (!%p396_p7), %vm212_vm0, %v624_v0 }
  0x70 PF: > { %s214_s30 = sld [smem:[#allocation3 + %s686_s0]] }
  0x76   : > { %p397_p9 = scmp.eq.s32.totalorder %s214_s30, 0 }
  0x77   : > { %v219_v1 = vld [vmem:[%s179_s20] sm:$0xff] (!%p397_p9)  ;;  %vm222_vm1 = vcmask (!%p397_p9), 130048   ;;  %v625_v2 = vmov (!%p397_p9), 0.0   ;;  %v476_v5 = vld [vmem:[#allocation7] sm:$0xff] (!%p397_p9)   ;;  %vm626_vm3 = vmmov (!%p397_p9), 0   ;;  %vm290_vm5 = vcmask (!%p397_p9), 261120  }
  0x78   : > { %218 = sbr.rel (%p397_p9) target bundleno = 485 (0x1e5), region = 48  ;;  %vm220_vm2 = vcmp.ne.f32.partialorder (!%p397_p9), %v219_v1, -inf  ;;  %407 = vmatprep.subr.bf16.mxu0 (!%p397_p9), %v625_v2  ;;  %409 = vmatprep.mubr.msk.bf16.mxu0 (!%p397_p9), %vm626_vm3, %v625_v2  ;;  %v398_v9 = vld [vmem:[%s868_s3] ss:$0 sm:$0xff] (!%p397_p9) }
  0x79   : > { %v221_v3 = vsel (!%p397_p9), %vm220_vm2, 1.0, %v625_v2  ;;  %408 = vmatpush3.bf16.msra.mxu0 (!%p397_p9), %v476_v5 }
  0x7a   : > { %v223_v4 = vsel (!%p397_p9), %vm222_vm1, %v221_v3, -inf }
  0x7b   : > { %224 = vmax.xlane.f32.xlu0 (!%p397_p9), %v223_v4 }
 0x108   : > { %v225_v6 = vpop.xlane.xlu0 %224 }
 0x109   : > { %vm226_vm4 = vcmp.gt.f32.partialorder %v225_v6, 0.0 }
 0x10a   : > { %v229_v7 = vsel %vm226_vm4, %v219_v1, 0.0 }
 0x10b   : > { %v230_v8 = vpack.c.bf16 %v229_v7, %v229_v7 }
 0x10d   : > { %410 = vmatmul.mubr.msk.bf16.vlgmr.msra.gmra.mrb[0].mxu0 %vm222_vm1, %v230_v8 }
 0x1e0   : > { %v283_v10 = vpop.f32.mrb[0].mxu0 }
 0x1e1   : > { %v284_v11 = vadd.f32 %v398_v9, %v283_v10  ;;  %v411_v12 = vpop.f32.mrb[1].mxu0 }
 0x1e2   : > { %v286_v13 = vpop.f32.mrb[2].mxu0 }
 0x1e3   : > { %v289_v14 = vsel %vm226_vm4, %v284_v11, -inf  ;;  %v412_v15 = vpop.f32.mrb[3].mxu0 }
 0x1e4   : > { %291 = vst.msk [vmem:[%s814_s17] sm:$0xff] %vm290_vm5, %v289_v14 }
 0x1e5 PF: > { %s402_s18 = sshll.u32 %s686_s0, 7  ;;  %s306_s24 = sshll.u32 %s814_s17, 4  ;;  %s307_s24 = int_to_ptr.vmem [resolvable:$true] %s306_s24 }
 0x1e6   : > { %s826_s23 = scalar_lea.hbm %s869_s4, %s402_s18  ;;  %s293_s13 = scalar_lea.sflag [#allocation6], %s801_s16 }
 0x1e7   : > { %s545_s14 = scalar_lea.vmem %s307_s24, 128  ;;  %s627_s15 = smov [#allocation9]  }
 0x1e8   : > { %p546_p11 = scmp.ne.s32.totalorder %s307_s24, %s545_s14  ;;  %s549_s9 = sshll.u32 %s627_s15, 4  ;;  %s550_s9 = int_to_ptr.vmem [resolvable:$false] %s549_s9 }
 0x1e9   : > { %s551_s8 = scalar_lea.vmem %s550_s9, 256  ;;  %p552_p6 = scmp.lt.s32.totalorder %s307_s24, %s550_s9 }
 0x1ea   : > { %p547_p13 = pnand %p546_p11, %p756_p1  ;;  %p553_p10 = scmp.lt.s32.totalorder %s551_s8, %s545_s14 }
 0x1ec   : > { %p548_p2 = pneg %p547_p13  ;;  %p554_p12 = por %p553_p10, %p552_p6 }
 0x1ee   : > { %p555_p5 = pnand %p554_p12, %p548_p2 }
 0x1f0   : > { %558 = shalt.err (!%p555_p5)
}
 0x1f1   : > { %s559_s0 = scalar_lea.hbm %s826_s23, 128  ;;  %s563_s20 = scalar_lea.hbm %s869_s4, 256 }
 0x1f2   : > { %p560_p8 = scmp.ne.s32.totalorder %s826_s23, %s559_s0  ;;  %p564_p0 = scmp.lt.u32.totalorder %s826_s23, %s869_s4 }
 0x1f3   : > { %p565_p7 = scmp.lt.u32.totalorder %s563_s20, %s559_s0  ;;  %p567_p11 = scmp.lt.u32.totalorder %s559_s0, %s826_s23 }
 0x1f4   : > { %p561_p3 = pnand %p560_p8, %p756_p1 }
 0x1f5   : > { %p566_p9 = por %p565_p7, %p564_p0 }
 0x1f6   : > { %p562_p4 = pneg %p561_p3 }
 0x1f7   : > { %p568_p13 = por %p567_p11, %p566_p9 }
 0x1f9   : > { %p569_p2 = pnand %p568_p13, %p562_p4 }
 0x1fb   : > { %572 = shalt.err (!%p569_p2)
}
 0x1fc   : > { %419 = dma.vmem_to_hbm [thread:$0]  (%p756_p1), %s307_s24, 128, %s826_s23, %s293_s13  }
 0x1fd PF: > { %s318_s30 = sand.u32 1, %s605_s25   ;;  %p884_p6 = scmp.ne.s32.totalorder %s874_s5, 0 }
 0x1fe   : > { %p885_p10 = scmp.ge.s32.totalorder %s617_s28, 2  ;;  %s319_s11 = scalar_lea.sflag [#allocation6], %s318_s30 }
 0x200   : > { %p430_p12 = pnand %p885_p10, %p884_p6 }
 0x202   : > { %600 = dma.done.wait (!%p430_p12), %s319_s11, 128  }
 0x203   : > { %602 = vsyncadd (!%p430_p12), %s319_s11, 4294967168  ;;  %p22_p5 = scmp.ge.s32.totalorder %s721_s10, 4   ;;  %s886_s25 = smov %s609_s26 }
 0x204   : > { %s887_s26 = smov %s613_s27  ;;  %s888_s27 = smov %s752_s29 }
 0x205   : > { %s889_s28 = smov %s721_s10  ;;  %24 = sbr.rel (!%p22_p5) target bundleno = 18 (0x12), region = 89 }
 0x20c   :  { %324 = vsyncpa [#allocation5], 1 }
 0x20d   :  { %326 = vsyncpa [#allocation5 + $0x1], 1 }
 0x20e   :  { %327 = vsyncpa [#allocation8], 1 }
 0x20f   :  { %328 = vsyncpa [#allocation6], 1 }
 0x210   :  { %330 = vsyncpa [#allocation6 + $0x1], 1 }

</bundles_post_ra>
